<compile_context>
chip_gen: v6e
topology: v6e:2x2x1
jax: 0.10.0
libtpu: 0.0.40
codegen_flags: <defaults>
</compile_context>

<pallas_src>
import functools

import jax
import jax.numpy as jnp
from jax.experimental import pallas as pl
from jax.experimental.pallas import tpu as pltpu

HIDDEN = 128      # fixed by the PyTorch module
HEAD_PAD = 128    # lane-dense fused head width (>= action_dim + 1)
NEG_BIG = -1e30   # effectively -inf for the softmax lane mask
TB_MAX = 1024     # max batch-tile rows (keeps live set << scoped VMEM defaults)


def _round_up(n, m):
    return ((n + m - 1) // m) * m


def policy_kernel(x_ref, w1_ref, b1_ref, w2_ref, b2_ref, wh_ref, bh_ref,
                  out_ref, *, action_dim):
    # bf16 cast of the streamed batch tile happens in-kernel (free VPU work
    # hidden under the MXU / DMA); weights are already bf16.
    x = x_ref[...].astype(jnp.bfloat16)

    # fc1 + relu (bf16 MXU operands, f32 accumulate / elementwise).
    h1 = jnp.dot(x, w1_ref[...], preferred_element_type=jnp.float32)
    h1 = jnp.maximum(h1 + b1_ref[...], 0.0)

    # fc2 + relu
    h2 = jnp.dot(h1.astype(jnp.bfloat16), w2_ref[...],
                 preferred_element_type=jnp.float32)
    h2 = jnp.maximum(h2 + b2_ref[...], 0.0)

    # Fused actor+critic head: lanes [0, A) are actor logits, lane A is the
    # critic value, lanes > A are exactly zero (zero-padded weights / bias).
    heads = jnp.dot(h2.astype(jnp.bfloat16), wh_ref[...],
                    preferred_element_type=jnp.float32)
    heads = heads + bh_ref[...]

    # (1, HEAD_PAD) lane mask, broadcast by jnp.where (no full-tile iota).
    lane = jax.lax.broadcasted_iota(jnp.int32, (1, HEAD_PAD), 1)
    act_mask = lane < action_dim

    # Numerically-stable softmax restricted to the actor lanes.  Exact
    # division (not approx reciprocal) so probabilities sum to 1 to f32
    # precision before the bf16 output cast.
    logits = jnp.where(act_mask, heads, NEG_BIG)
    m = jnp.max(logits, axis=-1, keepdims=True)
    e = jnp.exp(logits - m)                    # exp(NEG_BIG - m) underflows to 0
    denom = jnp.sum(e, axis=-1, keepdims=True)
    probs = e / denom

    # probs on actor lanes; raw head output (value / zeros) elsewhere.
    out_ref[...] = jnp.where(act_mask, probs, heads).astype(out_ref.dtype)


def pack_params(params):
    """One-time param packing (call OUTSIDE the hot path, cache the result).

    Builds the lane-dense fused actor+critic head and casts MXU operands to
    bf16 so the jitted forward does no per-call weight work.
    Returns (packed_param_dict, action_dim).
    """
    H = params["w1"].shape[1]
    A = params["wa"].shape[1]
    assert H == HIDDEN and A + 1 <= HEAD_PAD

    wh = jnp.zeros((H, HEAD_PAD), jnp.float32)
    wh = wh.at[:, :A].set(params["wa"]).at[:, A].set(params["wc"][:, 0])
    bh = jnp.zeros((1, HEAD_PAD), jnp.float32)
    bh = bh.at[:, :A].set(params["ba"]).at[:, A].set(params["bc"][:, 0])

    packed = {
        "w1": params["w1"].astype(jnp.bfloat16),
        "b1": params["b1"],                       # biases stay f32 (tiny)
        "w2": params["w2"].astype(jnp.bfloat16),
        "b2": params["b2"],
        "wh": wh.astype(jnp.bfloat16),
        "bh": bh,
    }
    return packed, A


@functools.partial(jax.jit, static_argnames=("action_dim",))
def policy_forward(x, packed, *, action_dim):
    """x: [B, state_dim] float32, packed: output of pack_params.

    Returns (action_probs [B, A] f32, state_value [B, 1] f32).
    For real rollouts, batch many env states per call rather than per-step.
    """
    B, S = x.shape
    H = HIDDEN
    A = action_dim

    # Batch tile: large enough to amortize the ~0.35 us per-grid-step overhead
    # and MXU weight push/drain, capped so large batches keep >= ~4 pipelined
    # grid steps.  16-sublane rounding for the bf16 output slab.  Live set at
    # tb=1024 is ~3.5 MiB -> inside v5e's 16 MiB / v6e-v7x's 32 MiB scoped
    # VMEM defaults, no vmem_limit_bytes override needed.
    tb = min(TB_MAX, _round_up(pl.cdiv(B, 4), 16))

    if B < tb:
        # Tiny inference batch: pad to one full, sublane-aligned tile.
        x_in = jnp.pad(x, ((0, tb - B), (0, 0)))
        b_out = tb
    else:
        # Large batch: no padding copy; a ragged last tile is handled by the
        # cdiv grid (out-of-bounds rows are garbage whose writes are masked).
        x_in = x
        b_out = B

    grid = (pl.cdiv(b_out, tb),)
    kernel = functools.partial(policy_kernel, action_dim=A)

    flops = 2 * b_out * (S * H + H * H + H * HEAD_PAD)
    bytes_accessed = (x_in.size * 4
                      + (packed["w1"].size + packed["w2"].size
                         + packed["wh"].size) * 2
                      + (packed["b1"].size + packed["b2"].size
                         + packed["bh"].size) * 4
                      + b_out * HEAD_PAD * 2)
    cost = pl.CostEstimate(flops=flops,
                           transcendentals=b_out * HEAD_PAD,
                           bytes_accessed=bytes_accessed)

    grid_spec = pltpu.PrefetchScalarGridSpec(
        num_scalar_prefetch=0,
        grid=grid,
        in_specs=[
            pl.BlockSpec((tb, S), lambda i: (i, 0)),        # x (streamed)
            pl.BlockSpec((S, H), lambda i: (0, 0)),         # w1 (resident)
            pl.BlockSpec((1, H), lambda i: (0, 0)),         # b1
            pl.BlockSpec((H, H), lambda i: (0, 0)),         # w2
            pl.BlockSpec((1, H), lambda i: (0, 0)),         # b2
            pl.BlockSpec((H, HEAD_PAD), lambda i: (0, 0)),  # fused heads W
            pl.BlockSpec((1, HEAD_PAD), lambda i: (0, 0)),  # fused heads b
        ],
        out_specs=pl.BlockSpec((tb, HEAD_PAD), lambda i: (i, 0)),
    )

    out = pl.pallas_call(
        kernel,
        out_shape=jax.ShapeDtypeStruct((b_out, HEAD_PAD), jnp.bfloat16),
        grid_spec=grid_spec,
        compiler_params=pltpu.CompilerParams(
            dimension_semantics=("parallel",)),
        cost_estimate=cost,
    )(x_in, packed["w1"], packed["b1"], packed["w2"], packed["b2"],
      packed["wh"], packed["bh"])

    probs = out[:B, :A].astype(jnp.float32)
    value = out[:B, A:A + 1].astype(jnp.float32)
    return probs, value


def init_params(key, state_dim, action_dim, hidden=HIDDEN):
    """Deterministic init mimicking nn.Linear's U(-1/sqrt(fan_in), ...)."""
    def linear(k, fan_in, fan_out):
        kw, kb = jax.random.split(k)
        bound = 1.0 / jnp.sqrt(jnp.float32(fan_in))
        w = jax.random.uniform(kw, (fan_in, fan_out), jnp.float32, -bound, bound)
        b = jax.random.uniform(kb, (1, fan_out), jnp.float32, -bound, bound)
        return w, b

    k1, k2, k3, k4 = jax.random.split(key, 4)
    w1, b1 = linear(k1, state_dim, hidden)
    w2, b2 = linear(k2, hidden, hidden)
    wa, ba = linear(k3, hidden, action_dim)
    wc, bc = linear(k4, hidden, 1)
    return {"w1": w1, "b1": b1, "w2": w2, "b2": b2,
            "wa": wa, "ba": ba, "wc": wc, "bc": bc}


def policy_ref(x, p):
    """Pure-JAX f32 reference for correctness checking."""
    h1 = jnp.maximum(x @ p["w1"] + p["b1"], 0.0)
    h2 = jnp.maximum(h1 @ p["w2"] + p["b2"], 0.0)
    probs = jax.nn.softmax(h2 @ p["wa"] + p["ba"], axis=-1)
    value = h2 @ p["wc"] + p["bc"]
    return probs, value


if __name__ == "__main__":
    key = jax.random.PRNGKey(0)
    kx, kp = jax.random.split(key)

    batch = 2
    state_dim = 16
    action_dim = 4

    x = jax.random.normal(kx, (batch, state_dim), jnp.float32)
    params = init_params(kp, state_dim, action_dim)

    # One-time packing (hoisted out of the per-step forward).
    packed, A = pack_params(params)

    probs, value = policy_forward(x, packed, action_dim=A)
    probs = jax.block_until_ready(probs)
    value = jax.block_until_ready(value)

    probs_r, value_r = policy_ref(x, params)
    assert probs.shape == (batch, action_dim)
    assert value.shape == (batch, 1)
    # bf16 MXU operands + bf16 output slab -> loosened tolerances.
    assert jnp.allclose(probs, probs_r, atol=2e-2, rtol=2e-2)
    assert jnp.allclose(value, value_r, atol=2e-2, rtol=2e-2)
    # probs sum to 1 in f32 inside the kernel; 1e-2 covers the bf16 output cast.
    assert jnp.allclose(jnp.sum(probs, axis=-1), 1.0, atol=1e-2)

    print("KERNEL_OK")
</pallas_src>

<mosaic_0001>
module attributes {stable_mosaic.version = 11 : i64} {
  func.func @policy_kernel(%arg0: i32, %arg1: memref<16x16xf32, #tpu.memory_space<vmem>>, %arg2: memref<16x128xbf16, #tpu.memory_space<vmem>>, %arg3: memref<1x128xf32, #tpu.memory_space<vmem>>, %arg4: memref<128x128xbf16, #tpu.memory_space<vmem>>, %arg5: memref<1x128xf32, #tpu.memory_space<vmem>>, %arg6: memref<128x128xbf16, #tpu.memory_space<vmem>>, %arg7: memref<1x128xf32, #tpu.memory_space<vmem>>, %arg8: memref<16x128xbf16, #tpu.memory_space<vmem>>) attributes {dimension_semantics = [#tpu.dimension_semantics<parallel>], iteration_bounds = array<i64: 1>, scalar_prefetch = 0 : i64, scratch_operands = 0 : i64, tpu.core_type = #tpu.core_type<tc>, window_params = [{transform_indices = @transform_0, window_bounds = array<i64: 16, 16>}, {pipeline_mode = #tpu.pipeline_mode<synchronous>, transform_indices = @transform_1, window_bounds = array<i64: 16, 128>}, {pipeline_mode = #tpu.pipeline_mode<synchronous>, transform_indices = @transform_2, window_bounds = array<i64: 1, 128>}, {pipeline_mode = #tpu.pipeline_mode<synchronous>, transform_indices = @transform_3, window_bounds = array<i64: 128, 128>}, {pipeline_mode = #tpu.pipeline_mode<synchronous>, transform_indices = @transform_4, window_bounds = array<i64: 1, 128>}, {pipeline_mode = #tpu.pipeline_mode<synchronous>, transform_indices = @transform_5, window_bounds = array<i64: 128, 128>}, {pipeline_mode = #tpu.pipeline_mode<synchronous>, transform_indices = @transform_6, window_bounds = array<i64: 1, 128>}, {transform_indices = @transform_7, window_bounds = array<i64: 16, 128>}]} {
    %c0 = arith.constant 0 : index
    %c0_0 = arith.constant 0 : index
    %0 = vector.load %arg1[%c0, %c0_0] : memref<16x16xf32, #tpu.memory_space<vmem>>, vector<16x16xf32>
    %1 = arith.truncf %0 : vector<16x16xf32> to vector<16x16xbf16>
    %c0_1 = arith.constant 0 : index
    %c0_2 = arith.constant 0 : index
    %2 = vector.load %arg2[%c0_1, %c0_2] : memref<16x128xbf16, #tpu.memory_space<vmem>>, vector<16x128xbf16>
    %cst = arith.constant dense<0.000000e+00> : vector<16x128xf32>
    %3 = tpu.matmul %1, %2, %cst {dimension_numbers = #tpu.dot_dimension_numbers<[1], [0], [0], [1], [0, 0, 1, 1], [], []>} : vector<16x16xbf16>, vector<16x128xbf16>, vector<16x128xf32> -> vector<16x128xf32>
    %c0_3 = arith.constant 0 : index
    %c0_4 = arith.constant 0 : index
    %4 = vector.load %arg3[%c0_3, %c0_4] : memref<1x128xf32, #tpu.memory_space<vmem>>, vector<1x128xf32>
    %5 = vector.broadcast %4 : vector<1x128xf32> to vector<16x128xf32>
    %6 = arith.addf %3, %5 : vector<16x128xf32>
    %cst_5 = arith.constant 0.000000e+00 : f32
    %7 = vector.broadcast %cst_5 : f32 to vector<16x128xf32>
    %8 = arith.maximumf %6, %7 : vector<16x128xf32>
    %9 = arith.truncf %8 : vector<16x128xf32> to vector<16x128xbf16>
    %c0_6 = arith.constant 0 : index
    %c0_7 = arith.constant 0 : index
    %10 = vector.load %arg4[%c0_6, %c0_7] : memref<128x128xbf16, #tpu.memory_space<vmem>>, vector<128x128xbf16>
    %cst_8 = arith.constant dense<0.000000e+00> : vector<16x128xf32>
    %11 = tpu.matmul %9, %10, %cst_8 {dimension_numbers = #tpu.dot_dimension_numbers<[1], [0], [0], [1], [0, 0, 1, 1], [], []>} : vector<16x128xbf16>, vector<128x128xbf16>, vector<16x128xf32> -> vector<16x128xf32>
    %c0_9 = arith.constant 0 : index
    %c0_10 = arith.constant 0 : index
    %12 = vector.load %arg5[%c0_9, %c0_10] : memref<1x128xf32, #tpu.memory_space<vmem>>, vector<1x128xf32>
    %13 = vector.broadcast %12 : vector<1x128xf32> to vector<16x128xf32>
    %14 = arith.addf %11, %13 : vector<16x128xf32>
    %cst_11 = arith.constant 0.000000e+00 : f32
    %15 = vector.broadcast %cst_11 : f32 to vector<16x128xf32>
    %16 = arith.maximumf %14, %15 : vector<16x128xf32>
    %17 = arith.truncf %16 : vector<16x128xf32> to vector<16x128xbf16>
    %c0_12 = arith.constant 0 : index
    %c0_13 = arith.constant 0 : index
    %18 = vector.load %arg6[%c0_12, %c0_13] : memref<128x128xbf16, #tpu.memory_space<vmem>>, vector<128x128xbf16>
    %cst_14 = arith.constant dense<0.000000e+00> : vector<16x128xf32>
    %19 = tpu.matmul %17, %18, %cst_14 {dimension_numbers = #tpu.dot_dimension_numbers<[1], [0], [0], [1], [0, 0, 1, 1], [], []>} : vector<16x128xbf16>, vector<128x128xbf16>, vector<16x128xf32> -> vector<16x128xf32>
    %c0_15 = arith.constant 0 : index
    %c0_16 = arith.constant 0 : index
    %20 = vector.load %arg7[%c0_15, %c0_16] : memref<1x128xf32, #tpu.memory_space<vmem>>, vector<1x128xf32>
    %21 = vector.broadcast %20 : vector<1x128xf32> to vector<16x128xf32>
    %22 = arith.addf %19, %21 : vector<16x128xf32>
    %23 = tpu.iota {dimensions = array<i32: 1>} : vector<1x128xi32>
    %c4_i32 = arith.constant 4 : i32
    %24 = vector.broadcast %c4_i32 : i32 to vector<1x128xi32>
    %25 = arith.cmpi slt, %23, %24 : vector<1x128xi32>
    %cst_17 = arith.constant -1.000000e+30 : f32
    %26 = vector.shape_cast %25 : vector<1x128xi1> to vector<1x128xi1>
    %27 = vector.broadcast %26 : vector<1x128xi1> to vector<16x128xi1>
    %28 = vector.broadcast %cst_17 : f32 to vector<16x128xf32>
    %29 = arith.select %27, %22, %28 : vector<16x128xi1>, vector<16x128xf32>
    %cst_18 = arith.constant dense<0xFF800000> : vector<16xf32>
    %30 = vector.multi_reduction <maximumf>, %29, %cst_18 [1] : vector<16x128xf32> to vector<16xf32>
    %31 = vector.shape_cast %30 : vector<16xf32> to vector<16x1xf32>
    %32 = vector.broadcast %31 : vector<16x1xf32> to vector<16x128xf32>
    %33 = arith.subf %29, %32 : vector<16x128xf32>
    %34 = math.exp %33 : vector<16x128xf32>
    %cst_19 = arith.constant dense<0.000000e+00> : vector<16xf32>
    %35 = vector.multi_reduction <add>, %34, %cst_19 [1] : vector<16x128xf32> to vector<16xf32>
    %36 = vector.shape_cast %35 : vector<16xf32> to vector<16x1xf32>
    %37 = vector.broadcast %36 : vector<16x1xf32> to vector<16x128xf32>
    %38 = arith.divf %34, %37 : vector<16x128xf32>
    %39 = vector.shape_cast %25 : vector<1x128xi1> to vector<1x128xi1>
    %40 = vector.broadcast %39 : vector<1x128xi1> to vector<16x128xi1>
    %41 = arith.select %40, %38, %22 : vector<16x128xi1>, vector<16x128xf32>
    %42 = arith.truncf %41 : vector<16x128xf32> to vector<16x128xbf16>
    %c0_20 = arith.constant 0 : index
    %c0_21 = arith.constant 0 : index
    %43 = vector.load %arg8[%c0_20, %c0_21] : memref<16x128xbf16, #tpu.memory_space<vmem>>, vector<16x128xbf16>
    tpu.vector_store %arg8[%c0_20, %c0_21], %42 {strides = array<i32>} : memref<16x128xbf16, #tpu.memory_space<vmem>>, vector<16x128xbf16>,
    return
  }
  func.func @transform_0(%arg0: i32) -> (i32, i32) {
    %c0_i32 = arith.constant 0 : i32
    %c0_i32_0 = arith.constant 0 : i32
    return %arg0, %c0_i32 : i32, i32
  }
  func.func @transform_1(%arg0: i32) -> (i32, i32) {
    %c0_i32 = arith.constant 0 : i32
    %c0_i32_0 = arith.constant 0 : i32
    %c0_i32_1 = arith.constant 0 : i32
    return %c0_i32, %c0_i32_0 : i32, i32
  }
  func.func @transform_2(%arg0: i32) -> (i32, i32) {
    %c0_i32 = arith.constant 0 : i32
    %c0_i32_0 = arith.constant 0 : i32
    %c0_i32_1 = arith.constant 0 : i32
    return %c0_i32, %c0_i32_0 : i32, i32
  }
  func.func @transform_3(%arg0: i32) -> (i32, i32) {
    %c0_i32 = arith.constant 0 : i32
    %c0_i32_0 = arith.constant 0 : i32
    %c0_i32_1 = arith.constant 0 : i32
    return %c0_i32, %c0_i32_0 : i32, i32
  }
  func.func @transform_4(%arg0: i32) -> (i32, i32) {
    %c0_i32 = arith.constant 0 : i32
    %c0_i32_0 = arith.constant 0 : i32
    %c0_i32_1 = arith.constant 0 : i32
    return %c0_i32, %c0_i32_0 : i32, i32
  }
  func.func @transform_5(%arg0: i32) -> (i32, i32) {
    %c0_i32 = arith.constant 0 : i32
    %c0_i32_0 = arith.constant 0 : i32
    %c0_i32_1 = arith.constant 0 : i32
    return %c0_i32, %c0_i32_0 : i32, i32
  }
  func.func @transform_6(%arg0: i32) -> (i32, i32) {
    %c0_i32 = arith.constant 0 : i32
    %c0_i32_0 = arith.constant 0 : i32
    %c0_i32_1 = arith.constant 0 : i32
    return %c0_i32, %c0_i32_0 : i32, i32
  }
  func.func @transform_7(%arg0: i32) -> (i32, i32) {
    %c0_i32 = arith.constant 0 : i32
    %c0_i32_0 = arith.constant 0 : i32
    return %arg0, %c0_i32 : i32, i32
  }
}

</mosaic_0001>

<bundles_post_ra>
// kernel: policy_forward.1
= control target key start
LH: loop header
LB: loop body
LE: loop exit
PB: predicated region body
PF: predicated region fallthrough
CT: control target
= control target key end

     0   :  { %12 = vsyncpa [#allocation3], 0  ;;  %s662_s0 = inlined_call_operand.vmem [shape: f32[16,16], index: 0, kind: input, shape index: {}]   ;;  %s663_s1 = inlined_call_operand.vmem [shape: bf16[16,128], index: 1, kind: input, shape index: {}]   ;;  %s664_s2 = inlined_call_operand.vmem [shape: f32[1,128], index: 2, kind: input, shape index: {}]   ;;  %s665_s3 = inlined_call_operand.hbm [shape: bf16[128,128], index: 3, kind: input, shape index: {}]   ;;  %s666_s4 = inlined_call_operand.vmem [shape: f32[1,128], index: 4, kind: input, shape index: {}]   ;;  %s667_s5 = inlined_call_operand.hbm [shape: bf16[128,128], index: 5, kind: input, shape index: {}]   ;;  %s668_s6 = inlined_call_operand.vmem [shape: f32[1,128], index: 6, kind: input, shape index: {}]   ;;  %s669_s7 = inlined_call_operand.vmem [shape: bf16[16,128], index: 7, kind: output, shape index: {}]  }
   0x1   :  { %13 = vsyncpa [#allocation5], 0  ;;  %s562_s24 = smov [#allocation2]  }
   0x2   :  { %s25_s25 = sshll.u32 %s562_s24, 4  ;;  %s26_s25 = int_to_ptr.vmem [resolvable:$true] %s25_s25 }
   0x3   :  { %s526_s26 = scalar_lea.vmem %s26_s25, 1024  ;;  %p531_p1 = scmp.lt.s32.totalorder %s26_s25, %s26_s25 }
   0x4   :  { %p527_p0 = scmp.ne.s32.totalorder %s26_s25, %s526_s26  ;;  %p532_p2 = scmp.lt.s32.totalorder %s526_s26, %s526_s26 }
   0x6   :  { %p533_p3 = por %p532_p2, %p531_p1 }
   0x8   :  { %p534_p4 = pnand %p533_p3, %p527_p0 }
   0xa   :  { %537 = shalt.err (!%p534_p4)
}
   0xb   :  { %s563_s27 = smov 64   ;;  %s564_s28 = smov 4  }
   0xc   :  { %31 = dma.hbm_to_vmem [thread:$0]  %s665_s3, 1024, %s26_s25, [#allocation3], %s563_s27, %s563_s27, %s564_s28  }
   0xd   :  { %s565_s8 = smov [#allocation4]  }
   0xe   :  { %s39_s9 = sshll.u32 %s565_s8, 4  ;;  %s40_s9 = int_to_ptr.vmem [resolvable:$true] %s39_s9 }
   0xf   :  { %s546_s10 = scalar_lea.vmem %s40_s9, 1024  ;;  %p551_p6 = scmp.lt.s32.totalorder %s40_s9, %s40_s9 }
  0x10   :  { %p547_p5 = scmp.ne.s32.totalorder %s40_s9, %s546_s10  ;;  %p552_p7 = scmp.lt.s32.totalorder %s546_s10, %s546_s10 }
  0x12   :  { %p553_p8 = por %p552_p7, %p551_p6 }
  0x14   :  { %p554_p9 = pnand %p553_p8, %p547_p5 }
  0x16   :  { %557 = shalt.err (!%p554_p9)
}
  0x17   :  { %45 = dma.hbm_to_vmem [thread:$0]  %s667_s5, 1024, %s40_s9, [#allocation5], %s563_s27, %s563_s27, %s564_s28  }
  0x18   :  { %558 = dma.done.wait [#allocation3], 1024  }
  0x19   :  { %559 = vsyncadd [#allocation3], 4294966272 }
  0x1a   :  { %560 = dma.done.wait [#allocation5], 1024  }
  0x1b   :  { %561 = vsyncadd [#allocation5], 4294966272  ;;  %v566_v0 = vmov 0.0   ;;  %vm567_vm0 = vmmov 0   ;;  %v493_v1 = vld [vmem:[%s663_s1] sm:$0xff]   ;;  %v56_v3 = vld [vmem:[%s662_s0 + $0x8] sm:$0xff]  ;;  %v348_v41 = vlaneseq }
  0x1c   :  { %441 = vmatprep.subr.bf16.mxu0 %v566_v0  ;;  %443 = vmatprep.mubr.msk.bf16.mxu0 %vm567_vm0, %v566_v0  ;;  %v55_v2 = vld [vmem:[%s662_s0] sm:$0xff]  ;;  %vm73_vm1 = vcmask 130048   ;;  %v494_v5 = vld [vmem:[#allocation2 + $0x38] sm:$0xff]   ;;  %v495_v6 = vld [vmem:[#allocation2 + $0x30] sm:$0xff]  }
  0x1d   :  { %447 = vmatprep.subr.bf16.mxu1 %v566_v0  ;;  %463 = vmatprep.mubr.msk.bf16.mxu1 %vm567_vm0, %v566_v0  ;;  %v57_v4 = vpack.c.bf16 %v56_v3, %v55_v2  ;;  %v496_v7 = vld [vmem:[#allocation2 + $0x28] sm:$0xff]   ;;  %v497_v8 = vld [vmem:[#allocation2 + $0x20] sm:$0xff]   ;;  %v498_v9 = vld [vmem:[#allocation2 + $0x18] sm:$0xff]   ;;  %v349_v42 = vand.u32 127, %v348_v41 }
  0x1e   :  { %442 = vmatpush3.bf16.msra.mxu0 %v493_v1  ;;  %448 = vmatpush3.bf16.msra.mxu1 %v494_v5  ;;  %v499_v10 = vld [vmem:[#allocation2 + $0x10] sm:$0xff]   ;;  %v500_v11 = vld [vmem:[#allocation2 + $0x8] sm:$0xff]   ;;  %v501_v12 = vld [vmem:[#allocation2] sm:$0xff]  }
  0x1f   :  { %467 = vmatprep.subr.bf16.mxu0 %v566_v0  ;;  %449 = vmatprep.subr.bf16.mxu1 %v566_v0  ;;  %v502_v13 = vld [vmem:[#allocation4 + $0x38] sm:$0xff]   ;;  %v503_v14 = vld [vmem:[#allocation4 + $0x30] sm:$0xff]   ;;  %v504_v15 = vld [vmem:[#allocation4 + $0x28] sm:$0xff]   ;;  %vm350_vm2 = vcmp.lt.s32.totalorder %v349_v42, 4 }
  0x20   :  { %v505_v16 = vld [vmem:[#allocation4 + $0x20] sm:$0xff]   ;;  %v506_v17 = vld [vmem:[#allocation4 + $0x18] sm:$0xff]   ;;  %v507_v28 = vld [vmem:[#allocation4 + $0x10] sm:$0xff]  }
  0x21   :  { %444 = vmatmul.mubr.msk.bf16.vlgmr.msra.gmra.mxu0 %vm73_vm1, %v57_v4  ;;  %v391_v18 = vld [vmem:[%s664_s2] ss:$0 sm:$0xff]  ;;  %v508_v29 = vld [vmem:[#allocation4 + $0x8] sm:$0xff]  }
  0x22   :  { %483 = vmatprep.mubr.msk.bf16.mxu0 %vm567_vm0, %v566_v0  ;;  %450 = vmatpush3.bf16.msra.mxu1 %v495_v6  ;;  %v509_v30 = vld [vmem:[#allocation4] sm:$0xff]  }
  0x23   :  { %451 = vmatprep.subr.bf16.mxu1 %v566_v0  ;;  %468 = vmatpush3.bf16.msra.mxu0 %v502_v13  ;;  %v394_v31 = vld [vmem:[%s666_s4] ss:$0 sm:$0xff] }
  0x24   :  { %469 = vmatprep.subr.bf16.mxu0 %v566_v0  ;;  %v403_v43 = vld [vmem:[%s668_s6] ss:$0 sm:$0xff] }
  0x26   :  { %452 = vmatpush3.bf16.msra.mxu1 %v496_v7 }
  0x27   :  { %453 = vmatprep.subr.bf16.mxu1 %v566_v0  ;;  %470 = vmatpush3.bf16.msra.mxu0 %v503_v14 }
  0x28   :  { %471 = vmatprep.subr.bf16.mxu0 %v566_v0 }
  0x2a   :  { %454 = vmatpush3.bf16.msra.mxu1 %v497_v8 }
  0x2b   :  { %455 = vmatprep.subr.bf16.mxu1 %v566_v0  ;;  %472 = vmatpush3.bf16.msra.mxu0 %v504_v15 }
  0x2c   :  { %473 = vmatprep.subr.bf16.mxu0 %v566_v0 }
  0x2e   :  { %456 = vmatpush3.bf16.msra.mxu1 %v498_v9 }
  0x2f   :  { %457 = vmatprep.subr.bf16.mxu1 %v566_v0  ;;  %474 = vmatpush3.bf16.msra.mxu0 %v505_v16 }
  0x30   :  { %475 = vmatprep.subr.bf16.mxu0 %v566_v0 }
  0x32   :  { %458 = vmatpush3.bf16.msra.mxu1 %v499_v10 }
  0x33   :  { %459 = vmatprep.subr.bf16.mxu1 %v566_v0  ;;  %476 = vmatpush3.bf16.msra.mxu0 %v506_v17 }
  0x34   :  { %477 = vmatprep.subr.bf16.mxu0 %v566_v0 }
  0x36   :  { %460 = vmatpush3.bf16.msra.mxu1 %v500_v11 }
  0x37   :  { %461 = vmatprep.subr.bf16.mxu1 %v566_v0  ;;  %478 = vmatpush3.bf16.msra.mxu0 %v507_v28 }
  0x38   :  { %479 = vmatprep.subr.bf16.mxu0 %v566_v0 }
  0x3a   :  { %462 = vmatpush3.bf16.msra.mxu1 %v501_v12 }
  0x3b   :  { %480 = vmatpush3.bf16.msra.mxu0 %v508_v29 }
  0x3c   :  { %481 = vmatprep.subr.bf16.mxu0 %v566_v0 }
  0x3f   :  { %482 = vmatpush3.bf16.msra.mxu0 %v509_v30 }
  0xe1   :  { %v111_v19 = vpop.f32.mrf.mxu0 }
  0xe2   :  { %v112_v21 = vadd.f32 %v391_v18, %v111_v19 }
  0xe3   :  { %v445_v20 = vpop.f32.mrf.mxu0 }
  0xe4   :  { %v118_v25 = vmax.f32 %v112_v21, 0.0 }
  0xe5   :  { %v114_v22 = vpop.f32.mrf.mxu0 }
  0xe6   :  { %v115_v23 = vadd.f32 %v391_v18, %v114_v22 }
  0xe7   :  { %v446_v24 = vpop.f32.mrf.mxu0 }
  0xe8   :  { %v119_v26 = vmax.f32 %v115_v23, 0.0 }
  0xea   :  { %v120_v27 = vpack.c.bf16 %v119_v26, %v118_v25 }
  0xec   :  { %464 = vmatmul.mubr.bf16.vlgmr.msra.gmra.mxu1 %v120_v27 }
 0x1ac   :  { %v226_v32 = vpop.f32.mrf.mxu1 }
 0x1ad   :  { %v227_v34 = vadd.f32 %v394_v31, %v226_v32 }
 0x1ae   :  { %v465_v33 = vpop.f32.mrf.mxu1 }
 0x1af   :  { %v233_v38 = vmax.f32 %v227_v34, 0.0 }
 0x1b0   :  { %v229_v35 = vpop.f32.mrf.mxu1 }
 0x1b1   :  { %v230_v36 = vadd.f32 %v394_v31, %v229_v35 }
 0x1b2   :  { %v466_v37 = vpop.f32.mrf.mxu1 }
 0x1b3   :  { %v234_v39 = vmax.f32 %v230_v36, 0.0 }
 0x1b5   :  { %v235_v40 = vpack.c.bf16 %v234_v39, %v233_v38 }
 0x1b7   :  { %484 = vmatmul.mubr.bf16.vlgmr.msra.gmra.mxu0 %v235_v40 }
 0x277   :  { %v341_v44 = vpop.f32.mrf.mxu0 }
 0x278   :  { %v342_v45 = vadd.f32 %v403_v43, %v341_v44 }
 0x279   :  { %v485_v46 = vpop.f32.mrf.mxu0 }
 0x27a   :  { %v353_v47 = vsel %vm350_vm2, %v342_v45, -1e+30 }
 0x27b   :  { %355 = vmax.xlane.f32.xlu0 %v353_v47  ;;  %v344_v48 = vpop.f32.mrf.mxu0 }
 0x27c   :  { %v345_v49 = vadd.f32 %v403_v43, %v344_v48 }
 0x27d   :  { %v486_v50 = vpop.f32.mrf.mxu0 }
 0x27e   :  { %v354_v51 = vsel %vm350_vm2, %v345_v49, -1e+30 }
 0x27f   :  { %357 = vmax.xlane.f32.xlu0 %v354_v51 }
 0x304   :  { %v356_v52 = vpop.xlane.xlu0 %355 }
 0x305   :  { %v359_v53 = vsub.f32 %v353_v47, %v356_v52 }
 0x307   :  { %v361_v54 = vmul.f32 1.442695, %v359_v53 }
 0x308   :  { %v358_v55 = vpop.xlane.xlu0 %357 }
 0x309   :  { %510 = vpow2.f32 %v361_v54  ;;  %v360_v56 = vsub.f32 %v354_v51, %v358_v55 }
 0x30b   :  { %v363_v57 = vmul.f32 1.442695, %v360_v56 }
 0x30d   :  { %512 = vpow2.f32 %v363_v57 }
 0x316   :  { %v511_v58 = vpop.eup %510 }
 0x317   :  { %365 = vadd.xlane.f32.xlu1 %v511_v58 }
 0x31a   :  { %v513_v59 = vpop.eup %512 }
 0x31b   :  { %367 = vadd.xlane.f32.xlu1 %v513_v59 }
 0x3a0   :  { %v366_v60 = vpop.xlane.xlu1 %365 }
 0x3a1   :  { %514 = vrcp.f32 %v366_v60 }
 0x3a4   :  { %v368_v61 = vpop.xlane.xlu1 %367 }
 0x3a5   :  { %516 = vrcp.f32 %v368_v61 }
 0x3ae   :  { %v515_v62 = vpop.eup %514 }
 0x3af   :  { %v370_v63 = vmul.f32 %v515_v62, %v511_v58 }
 0x3b1   :  { %v373_v2 = vsel %vm350_vm2, %v370_v63, %v342_v45 }
 0x3b2   :  { %v517_v0 = vpop.eup %516 }
 0x3b3   :  { %v372_v1 = vmul.f32 %v517_v0, %v513_v59 }
 0x3b5   :  { %v374_v3 = vsel %vm350_vm2, %v372_v1, %v345_v49 }
 0x3b6   :  { %v419_v4 = vpack.c.bf16 %v374_v3, %v373_v2 }
 0x3b8   :  { %420 = vst [vmem:[%s669_s7] sm:$0xff] %v419_v4  }
 0x3b9   :  { %389 = vsyncpa [#allocation3], 1 }
 0x3ba   :  { %390 = vsyncpa [#allocation5], 1 }

</bundles_post_ra>
